<compile_context>
chip_gen: v6e
topology: v6e:2x2x1
jax: 0.10.0
libtpu: 0.0.40
codegen_flags: <defaults>
</compile_context>

<pallas_src>
import math

import jax
import jax.numpy as jnp
from jax import lax
from jax.experimental import pallas as pl
from jax.experimental.pallas import tpu as pltpu


_VMEM_LIMIT_BYTES = 48 * 1024 * 1024  # explicit budget; fits v7x's 64 MiB VMEM


# ----------------------------------------------------------------------------
# Kernel 1: tiled dense linear  y = x @ W_t + b
#   x   : [N, din]          (tiled (tm, tk))
#   W_t : [din, dout]       (pre-transposed, tiled (tk, tn))
#   b   : [1, dout]         (tiled (1, tn), added on the last K step only)
# ----------------------------------------------------------------------------
def linear_kernel(x_ref, w_ref, b_ref, o_ref, acc_ref):
    k = pl.program_id(2)

    @pl.when(k == 0)
    def _():
        acc_ref[...] = jnp.zeros(acc_ref.shape, jnp.float32)

    acc_ref[...] += jnp.dot(x_ref[...], w_ref[...],
                            preferred_element_type=jnp.float32)

    @pl.when(k == pl.num_programs(2) - 1)
    def _():
        o_ref[...] = (acc_ref[...] + b_ref[...].astype(jnp.float32)
                      ).astype(o_ref.dtype)


def pallas_linear(x, w_t, b, *, tm=256, tn=256, tk=512):
    """x: [N, din], w_t: [din, dout] (pre-transposed), b: [dout] -> [N, dout]."""
    n, din = x.shape
    dout = w_t.shape[1]

    tm = min(tm, n)
    tn = min(tn, dout)
    # The reduction (K) axis must tile exactly: padded edge blocks would add
    # garbage into the accumulator.  M / N ragged edges are safe (dropped).
    tk = tk if (din % tk == 0) else din

    b2 = b.reshape(1, dout)
    grid = (pl.cdiv(n, tm), pl.cdiv(dout, tn), din // tk)

    return pl.pallas_call(
        linear_kernel,
        out_shape=jax.ShapeDtypeStruct((n, dout), x.dtype),
        grid=grid,
        in_specs=[
            pl.BlockSpec((tm, tk), lambda i, j, k: (i, k)),
            pl.BlockSpec((tk, tn), lambda i, j, k: (k, j)),
            pl.BlockSpec((1, tn), lambda i, j, k: (0, j)),
        ],
        out_specs=pl.BlockSpec((tm, tn), lambda i, j, k: (i, j)),
        scratch_shapes=[pltpu.VMEM((tm, tn), jnp.float32)],
        compiler_params=pltpu.CompilerParams(
            dimension_semantics=("parallel", "parallel", "arbitrary"),
            vmem_limit_bytes=_VMEM_LIMIT_BYTES),
    )(x, w_t, b2)


# ----------------------------------------------------------------------------
# Kernel 2: flash-style attention, grid (B*H, Lq tiles, Lk tiles)
#   q, k, v : [BH, L, D]; the 1/sqrt(D) scale is already folded into q.
# ----------------------------------------------------------------------------
def flash_attention_kernel(q_ref, k_ref, v_ref, o_ref, m_ref, l_ref, acc_ref):
    ki = pl.program_id(2)

    @pl.when(ki == 0)
    def _():
        m_ref[...] = jnp.full(m_ref.shape, -jnp.inf, jnp.float32)
        l_ref[...] = jnp.zeros(l_ref.shape, jnp.float32)
        acc_ref[...] = jnp.zeros(acc_ref.shape, jnp.float32)

    q = q_ref[0]                                   # (tq, D)
    k = k_ref[0]                                   # (tk, D)
    v = v_ref[0]                                   # (tk, D)

    # q @ k^T without an explicit transpose: contract the last dims directly.
    s = lax.dot_general(q, k, (((1,), (1,)), ((), ())),
                        preferred_element_type=jnp.float32)   # (tq, tk)

    m_prev = m_ref[...]                            # (tq, 1)
    m_new = jnp.maximum(m_prev, jnp.max(s, axis=-1, keepdims=True))
    alpha = jnp.exp(m_prev - m_new)                # rescale of previous stats
    p = jnp.exp(s - m_new)                         # (tq, tk), f32

    l_ref[...] = alpha * l_ref[...] + jnp.sum(p, axis=-1, keepdims=True)
    acc_ref[...] = alpha * acc_ref[...] + jnp.dot(
        p.astype(v.dtype), v, preferred_element_type=jnp.float32)
    m_ref[...] = m_new

    # dropout: identity (eval mode)
    @pl.when(ki == pl.num_programs(2) - 1)
    def _():
        inv_l = pl.reciprocal(l_ref[...], approx=True)
        o_ref[0] = (acc_ref[...] * inv_l).astype(o_ref.dtype)


def pallas_flash_attention(q, k, v, *, tq=128, tk=128):
    """q, k, v: [BH, L, D] -> context [BH, Lq, D] (scale pre-folded into q)."""
    bh, lq, d = q.shape
    lk = k.shape[1]

    tq = min(tq, lq)
    # The KV axis is the online-softmax reduction: tiles must cover Lk exactly.
    # TODO(synk): add explicit iota-based masking to allow ragged Lk tiles.
    tk = tk if (lk % tk == 0) else lk

    grid = (bh, pl.cdiv(lq, tq), lk // tk)

    return pl.pallas_call(
        flash_attention_kernel,
        out_shape=jax.ShapeDtypeStruct((bh, lq, d), q.dtype),
        grid=grid,
        in_specs=[
            pl.BlockSpec((1, tq, d), lambda b, qi, ki: (b, qi, 0)),
            pl.BlockSpec((1, tk, d), lambda b, qi, ki: (b, ki, 0)),
            pl.BlockSpec((1, tk, d), lambda b, qi, ki: (b, ki, 0)),
        ],
        out_specs=pl.BlockSpec((1, tq, d), lambda b, qi, ki: (b, qi, 0)),
        scratch_shapes=[
            pltpu.VMEM((tq, 1), jnp.float32),   # running max m
            pltpu.VMEM((tq, 1), jnp.float32),   # running denom l
            pltpu.VMEM((tq, d), jnp.float32),   # running context acc
        ],
        compiler_params=pltpu.CompilerParams(
            dimension_semantics=("parallel", "parallel", "arbitrary"),
            vmem_limit_bytes=_VMEM_LIMIT_BYTES),
    )(q, k, v)


# ----------------------------------------------------------------------------
# Parameter preparation (done once, outside the hot path)
# ----------------------------------------------------------------------------
def prepare_params(params, headcount, dimperhead):
    """Pre-transpose weights to [din, dout], fold 1/sqrt(D) into the query
    projection, and build fused QKV / KV weight blocks."""
    scale = 1.0 / math.sqrt(dimperhead)
    wq = params["query_w"] * scale
    bq = params["query_b"] * scale

    wk_t = jnp.transpose(params["keys_w"])
    wv_t = jnp.transpose(params["values_w"])
    wq_t = jnp.transpose(wq)

    return {
        "wk_t": wk_t, "bk": params["keys_b"],
        "wv_t": wv_t, "bv": params["values_b"],
        "wq_t": wq_t, "bq": bq,
        "wkv_t": jnp.concatenate([wk_t, wv_t], axis=1),
        "bkv": jnp.concatenate([params["keys_b"], params["values_b"]]),
        "wkvq_t": jnp.concatenate([wk_t, wv_t, wq_t], axis=1),
        "bkvq": jnp.concatenate([params["keys_b"], params["values_b"], bq]),
        "wfinal_t": jnp.transpose(params["final_w"]),
        "bfinal": params["final_b"],
    }


# ----------------------------------------------------------------------------
# Full module forward (glue in plain JAX, hot path in Pallas)
# ----------------------------------------------------------------------------
def multi_headed_attention_forward(prepared, key, value, query,
                                   headcount, dimperhead, uselinear=True):
    """key/value/query: [B, L, dimmodel] -> [B, Lq, dimmodel]."""
    b, lk, dm = key.shape
    lq = query.shape[1]

    # Projections (fused when inputs alias: reads the activations once and
    # gives the MXU a wider N per tile).
    if (query is key) and (key is value):
        qkv = pallas_linear(query.reshape(b * lq, dm),
                            prepared["wkvq_t"], prepared["bkvq"])
        k_proj = qkv[:, :dm]
        v_proj = qkv[:, dm:2 * dm]
        q_proj = qkv[:, 2 * dm:]
    elif key is value:
        kv = pallas_linear(key.reshape(b * lk, dm),
                           prepared["wkv_t"], prepared["bkv"])
        k_proj = kv[:, :dm]
        v_proj = kv[:, dm:]
        q_proj = pallas_linear(query.reshape(b * lq, dm),
                               prepared["wq_t"], prepared["bq"])
    else:
        k_proj = pallas_linear(key.reshape(b * lk, dm),
                               prepared["wk_t"], prepared["bk"])
        v_proj = pallas_linear(value.reshape(b * lk, dm),
                               prepared["wv_t"], prepared["bv"])
        q_proj = pallas_linear(query.reshape(b * lq, dm),
                               prepared["wq_t"], prepared["bq"])

    def split_heads(x2d, batch, seqlen):
        # [batch*seq, H*D] -> [batch*H, seq, D]
        return (x2d.reshape(batch, seqlen, headcount, dimperhead)
                   .transpose(0, 2, 1, 3)
                   .reshape(batch * headcount, seqlen, dimperhead))

    q_h = split_heads(q_proj, b, lq)
    k_h = split_heads(k_proj, b, lk)
    v_h = split_heads(v_proj, b, lk)

    ctx = pallas_flash_attention(q_h, k_h, v_h)          # [B*H, Lq, D]

    # unshape: [B*H, Lq, D] -> [B*Lq, H*D]
    ctx = (ctx.reshape(b, headcount, lq, dimperhead)
              .transpose(0, 2, 1, 3)
              .reshape(b * lq, headcount * dimperhead))

    if uselinear:
        out = pallas_linear(ctx, prepared["wfinal_t"], prepared["bfinal"])
        return out.reshape(b, lq, dm)
    return ctx.reshape(b, lq, headcount * dimperhead)


# ----------------------------------------------------------------------------
# Pure-JAX reference for correctness checking
# ----------------------------------------------------------------------------
def reference_forward(params, key, value, query, headcount, dimperhead):
    b, lk, dm = key.shape
    lq = query.shape[1]

    def lin(x, name):
        return x @ params[name + "_w"].T + params[name + "_b"]

    k_p = lin(key, "keys").reshape(b, lk, headcount, dimperhead).transpose(0, 2, 1, 3)
    v_p = lin(value, "values").reshape(b, lk, headcount, dimperhead).transpose(0, 2, 1, 3)
    q_p = lin(query, "query").reshape(b, lq, headcount, dimperhead).transpose(0, 2, 1, 3)
    q_p = q_p / math.sqrt(dimperhead)
    scores = jnp.einsum("bhqd,bhkd->bhqk", q_p, k_p)
    attn = jax.nn.softmax(scores, axis=-1)
    ctx = jnp.einsum("bhqk,bhkd->bhqd", attn, v_p)
    ctx = ctx.transpose(0, 2, 1, 3).reshape(b, lq, dm)
    return ctx @ params["final_w"].T + params["final_b"]


if __name__ == "__main__":
    # Small shapes consistent with the module: B=2, seq=8, dimmodel=32, heads=4
    B, L, DIMMODEL, HEADS = 2, 8, 32, 4
    DIMPERHEAD = DIMMODEL // HEADS

    root = jax.random.PRNGKey(0)
    keys = jax.random.split(root, 12)
    bound = 1.0 / math.sqrt(DIMMODEL)

    def init_linear(kw, kb, dout, din):
        w = jax.random.uniform(kw, (dout, din), jnp.float32, -bound, bound)
        bvec = jax.random.uniform(kb, (dout,), jnp.float32, -bound, bound)
        return w, bvec

    params = {}
    for idx, name in enumerate(["keys", "values", "query", "final"]):
        params[name + "_w"], params[name + "_b"] = init_linear(
            keys[2 * idx], keys[2 * idx + 1], DIMMODEL, DIMMODEL)

    prepared = prepare_params(params, HEADS, DIMPERHEAD)

    x_self = jax.random.normal(keys[8], (B, L, DIMMODEL), jnp.float32)
    mem = jax.random.normal(keys[9], (B, L, DIMMODEL), jnp.float32)
    q_in = jax.random.normal(keys[10], (B, L, DIMMODEL), jnp.float32)

    # 1) self-attention (fused QKV projection path)
    out_self = jax.block_until_ready(multi_headed_attention_forward(
        prepared, x_self, x_self, x_self, HEADS, DIMPERHEAD))
    ref_self = reference_forward(params, x_self, x_self, x_self, HEADS, DIMPERHEAD)
    assert out_self.shape == (B, L, DIMMODEL)
    assert jnp.allclose(out_self, ref_self, atol=2e-3, rtol=2e-3), "self-attn mismatch"

    # 2) encoder-decoder attention (fused KV path, separate query)
    out_ctx = jax.block_until_ready(multi_headed_attention_forward(
        prepared, mem, mem, q_in, HEADS, DIMPERHEAD))
    ref_ctx = reference_forward(params, mem, mem, q_in, HEADS, DIMPERHEAD)
    assert jnp.allclose(out_ctx, ref_ctx, atol=2e-3, rtol=2e-3), "ctx-attn mismatch"

    # 3) fully distinct key / value / query (separate projection path)
    out_gen = jax.block_until_ready(multi_headed_attention_forward(
        prepared, x_self, mem, q_in, HEADS, DIMPERHEAD))
    ref_gen = reference_forward(params, x_self, mem, q_in, HEADS, DIMPERHEAD)
    assert jnp.allclose(out_gen, ref_gen, atol=2e-3, rtol=2e-3), "general mismatch"

    print("KERNEL_OK")
</pallas_src>

<mosaic_0001>
module attributes {stable_mosaic.version = 11 : i64} {
  func.func @linear_kernel(%arg0: i32, %arg1: i32, %arg2: i32, %arg3: memref<16x32xf32, #tpu.memory_space<vmem>>, %arg4: memref<32x96xf32, #tpu.memory_space<vmem>>, %arg5: memref<1x96xf32, #tpu.memory_space<vmem>>, %arg6: memref<16x96xf32, #tpu.memory_space<vmem>>, %arg7: memref<16x96xf32, #tpu.memory_space<vmem>>) attributes {dimension_semantics = [#tpu.dimension_semantics<parallel>, #tpu.dimension_semantics<parallel>, #tpu.dimension_semantics<arbitrary>], iteration_bounds = array<i64: 1, 1, 1>, scalar_prefetch = 0 : i64, scratch_operands = 1 : i64, tpu.core_type = #tpu.core_type<tc>, window_params = [{transform_indices = @transform_0, window_bounds = array<i64: 16, 32>}, {transform_indices = @transform_1, window_bounds = array<i64: 32, 96>}, {transform_indices = @transform_2, window_bounds = array<i64: 1, 96>}, {transform_indices = @transform_3, window_bounds = array<i64: 16, 96>}]} {
    %c0_i32 = arith.constant 0 : i32
    %0 = arith.cmpi eq, %arg2, %c0_i32 : i32
    %1 = arith.extui %0 : i1 to i32
    %c0_i32_0 = arith.constant 0 : i32
    %2 = arith.cmpi ne, %1, %c0_i32_0 : i32
    scf.if %2 {
      %cst_10 = arith.constant 0.000000e+00 : f32
      %12 = vector.broadcast %cst_10 : f32 to vector<16x96xf32>
      %c0_11 = arith.constant 0 : index
      %c0_12 = arith.constant 0 : index
      %13 = vector.load %arg7[%c0_11, %c0_12] : memref<16x96xf32, #tpu.memory_space<vmem>>, vector<16x96xf32>
      tpu.vector_store %arg7[%c0_11, %c0_12], %12 {strides = array<i32>} : memref<16x96xf32, #tpu.memory_space<vmem>>, vector<16x96xf32>,
    } else {
    }
    %c0 = arith.constant 0 : index
    %c0_1 = arith.constant 0 : index
    %3 = vector.load %arg7[%c0, %c0_1] : memref<16x96xf32, #tpu.memory_space<vmem>>, vector<16x96xf32>
    %c0_2 = arith.constant 0 : index
    %c0_3 = arith.constant 0 : index
    %4 = vector.load %arg3[%c0_2, %c0_3] : memref<16x32xf32, #tpu.memory_space<vmem>>, vector<16x32xf32>
    %c0_4 = arith.constant 0 : index
    %c0_5 = arith.constant 0 : index
    %5 = vector.load %arg4[%c0_4, %c0_5] : memref<32x96xf32, #tpu.memory_space<vmem>>, vector<32x96xf32>
    %cst = arith.constant dense<0.000000e+00> : vector<16x96xf32>
    %6 = tpu.matmul %4, %5, %cst {dimension_numbers = #tpu.dot_dimension_numbers<[1], [0], [0], [1], [0, 0, 1, 1], [], []>} : vector<16x32xf32>, vector<32x96xf32>, vector<16x96xf32> -> vector<16x96xf32>
    %7 = arith.addf %3, %6 : vector<16x96xf32>
    %c0_6 = arith.constant 0 : index
    %c0_7 = arith.constant 0 : index
    %8 = vector.load %arg7[%c0_6, %c0_7] : memref<16x96xf32, #tpu.memory_space<vmem>>, vector<16x96xf32>
    tpu.vector_store %arg7[%c0_6, %c0_7], %7 {strides = array<i32>} : memref<16x96xf32, #tpu.memory_space<vmem>>, vector<16x96xf32>,
    %c0_i32_8 = arith.constant 0 : i32
    %9 = arith.cmpi eq, %arg2, %c0_i32_8 : i32
    %10 = arith.extui %9 : i1 to i32
    %c0_i32_9 = arith.constant 0 : i32
    %11 = arith.cmpi ne, %10, %c0_i32_9 : i32
    scf.if %11 {
      %c0_10 = arith.constant 0 : index
      %c0_11 = arith.constant 0 : index
      %12 = vector.load %arg7[%c0_10, %c0_11] : memref<16x96xf32, #tpu.memory_space<vmem>>, vector<16x96xf32>
      %c0_12 = arith.constant 0 : index
      %c0_13 = arith.constant 0 : index
      %13 = vector.load %arg5[%c0_12, %c0_13] : memref<1x96xf32, #tpu.memory_space<vmem>>, vector<1x96xf32>
      %14 = vector.broadcast %13 : vector<1x96xf32> to vector<16x96xf32>
      %15 = arith.addf %12, %14 : vector<16x96xf32>
      %c0_14 = arith.constant 0 : index
      %c0_15 = arith.constant 0 : index
      %16 = vector.load %arg6[%c0_14, %c0_15] : memref<16x96xf32, #tpu.memory_space<vmem>>, vector<16x96xf32>
      tpu.vector_store %arg6[%c0_14, %c0_15], %15 {strides = array<i32>} : memref<16x96xf32, #tpu.memory_space<vmem>>, vector<16x96xf32>,
    } else {
    }
    return
  }
  func.func @transform_0(%arg0: i32, %arg1: i32, %arg2: i32) -> (i32, i32) {
    %c0_i32 = arith.constant 0 : i32
    return %arg0, %arg2 : i32, i32
  }
  func.func @transform_1(%arg0: i32, %arg1: i32, %arg2: i32) -> (i32, i32) {
    %c0_i32 = arith.constant 0 : i32
    return %arg2, %arg1 : i32, i32
  }
  func.func @transform_2(%arg0: i32, %arg1: i32, %arg2: i32) -> (i32, i32) {
    %c0_i32 = arith.constant 0 : i32
    %c0_i32_0 = arith.constant 0 : i32
    return %c0_i32, %arg1 : i32, i32
  }
  func.func @transform_3(%arg0: i32, %arg1: i32, %arg2: i32) -> (i32, i32) {
    %c0_i32 = arith.constant 0 : i32
    return %arg0, %arg1 : i32, i32
  }
}

</mosaic_0001>

<bundles_post_ra>
// kernel: tpu_custom_call.1
= control target key start
LH: loop header
LB: loop body
LE: loop exit
PB: predicated region body
PF: predicated region fallthrough
CT: control target
= control target key end

     0   :  { %8 = vsyncpa [#allocation4], 0  ;;  %s326_s0 = inlined_call_operand.hbm [shape: f32[16,32], index: 0, kind: input, shape index: {}]   ;;  %s327_s1 = inlined_call_operand.hbm [shape: f32[32,96], index: 1, kind: input, shape index: {}]   ;;  %s328_s2 = inlined_call_operand.vmem [shape: f32[1,96], index: 2, kind: input, shape index: {}]   ;;  %s329_s3 = inlined_call_operand.hbm [shape: f32[16,96], index: 3, kind: output, shape index: {}]  }
   0x1   :  { %9 = vsyncpa [#allocation7], 0 }
   0x2   :  { %10 = vsyncpa [#allocation5], 0  ;;  %s271_s12 = smov [#allocation3]  }
   0x3   :  { %s16_s13 = sshll.u32 %s271_s12, 4  ;;  %s17_s13 = int_to_ptr.vmem [resolvable:$true] %s16_s13 }
   0x4   :  { %s213_s14 = scalar_lea.vmem %s17_s13, 256  ;;  %p218_p1 = scmp.lt.s32.totalorder %s17_s13, %s17_s13 }
   0x5   :  { %p214_p0 = scmp.ne.s32.totalorder %s17_s13, %s213_s14  ;;  %p219_p2 = scmp.lt.s32.totalorder %s213_s14, %s213_s14 }
   0x7   :  { %p220_p3 = por %p219_p2, %p218_p1 }
   0x9   :  { %p221_p4 = pnand %p220_p3, %p214_p0 }
   0xb   :  { %224 = shalt.err (!%p221_p4)
}
   0xc   :  { %s272_s15 = smov 128   ;;  %s273_s16 = smov 8  }
   0xd   :  { %22 = dma.hbm_to_vmem [thread:$0]  %s326_s0, 256, %s17_s13, [#allocation4], %s272_s15, %s272_s15, %s273_s16  }
   0xe   :  { %s274_s19 = smov [#allocation6]  }
   0xf   :  { %s28_s20 = sshll.u32 %s274_s19, 4  ;;  %s29_s20 = int_to_ptr.vmem [resolvable:$true] %s28_s20 }
  0x10   :  { %s233_s21 = scalar_lea.vmem %s29_s20, 512  ;;  %p238_p6 = scmp.lt.s32.totalorder %s29_s20, %s29_s20 }
  0x11   :  { %p234_p5 = scmp.ne.s32.totalorder %s29_s20, %s233_s21  ;;  %p239_p7 = scmp.lt.s32.totalorder %s233_s21, %s233_s21 }
  0x13   :  { %p240_p8 = por %p239_p7, %p238_p6 }
  0x15   :  { %p241_p9 = pnand %p240_p8, %p234_p5 }
  0x17   :  { %244 = shalt.err (!%p241_p9)
}
  0x18   :  { %34 = dma.hbm_to_vmem [thread:$0]  %s327_s1, 512, %s29_s20, [#allocation7], %s272_s15, %s272_s15, %s273_s16  }
  0x19   :  { %265 = dma.done.wait [#allocation4], 256  }
  0x1a   :  { %266 = vsyncadd [#allocation4], 4294967040 }
  0x1b   :  { %267 = dma.done.wait [#allocation7], 512  }
  0x1c   :  { %268 = vsyncadd [#allocation7], 4294966784  ;;  %vm47_vm0 = vcmask 785408   ;;  %v275_v0 = vmov 0.0   ;;  %vm58_vm1 = vcmask 261120   ;;  %v57_v1 = vld [vmem:[#allocation6 + $0x18] sm:$0xff] }
  0x1d   :  { %49 = vst.msk [vmem:[#allocation2 + $0x8] sm:$0xff] %vm47_vm0, %v275_v0  ;;  %48 = vst.msk [vmem:[#allocation2] sm:$0xff] %vm47_vm0, %v275_v0  ;;  %v56_v2 = vld [vmem:[#allocation6 + $0x10] sm:$0xff]  ;;  %188 = vmatprep.subr.mxu0 %v57_v1  ;;  %v55_v4 = vld [vmem:[#allocation6 + $0x8] sm:$0xff]  ;;  %s276_s24 = smov [#allocation8]  }
  0x1e   :  { %v52_v3 = vld [vmem:[#allocation3] sm:$0xff]  ;;  %189 = vmatpush3.msra.mxu0 %v57_v1  ;;  %v54_v5 = vld [vmem:[#allocation6] sm:$0xff]  ;;  %v53_v6 = vld [vmem:[#allocation3 + $0x8] sm:$0xff]  ;;  %s166_s25 = sshll.u32 %s276_s24, 4  ;;  %s167_s25 = int_to_ptr.vmem [resolvable:$true] %s166_s25 }
  0x1f   :  { %196 = vmatprep.mubr.msk.f32.mxu0 %vm58_vm1, %v52_v3  ;;  %190 = vmatprep.subr.mxu0 %v56_v2  ;;  %v181_v13 = vld [vmem:[%s328_s2] ss:$0 sm:$0xff]  ;;  %s245_s26 = scalar_lea.vmem %s167_s25, 256  ;;  %p250_p11 = scmp.lt.s32.totalorder %s167_s25, %s167_s25 }
  0x20   :  { %191 = vmatpush3.msra.mxu0 %v56_v2  ;;  %p246_p10 = scmp.ne.s32.totalorder %s167_s25, %s245_s26  ;;  %p251_p12 = scmp.lt.s32.totalorder %s245_s26, %s245_s26 }
  0x21   :  { %192 = vmatprep.subr.mxu0 %v55_v4 }
  0x22   :  { %193 = vmatpush3.msra.mxu0 %v55_v4  ;;  %p252_p13 = por %p251_p12, %p250_p11 }
  0x23   :  { %194 = vmatprep.subr.mxu0 %v54_v5 }
  0x24   :  { %195 = vmatpush3.msra.mxu0 %v54_v5  ;;  %v51_v7 = vld [vmem:[#allocation2 + $0x8] sm:$0xff]  ;;  %v50_v9 = vld [vmem:[#allocation2] sm:$0xff]  ;;  %p253_p0 = pnand %p252_p13, %p246_p10 }
  0x25   :  { %197 = vmatmul.mubr.msk.f32.vlgmr.msra.gmra.mxu0 %vm58_vm1, %v53_v6 }
  0xe5   :  { %v198_v8 = vpop.f32.mrf.mxu0 }
  0xe6   :  { %v141_v10 = vadd.f32 %v198_v8, %v51_v7 }
  0xe7   :  { %v131_v11 = vpop.f32.mrf.mxu0 }
  0xe8   :  { %144 = vst.msk [vmem:[#allocation2 + $0x8] sm:$0xff] %vm47_vm0, %v141_v10  ;;  %v140_v12 = vadd.f32 %v131_v11, %v50_v9 }
  0xea   :  { %143 = vst.msk [vmem:[#allocation2] sm:$0xff] %vm47_vm0, %v140_v12 }
  0xef   :  { %v149_v14 = vld [vmem:[#allocation2 + $0x8] sm:$0xff] }
  0xf0   :  { %v158_v15 = vadd.f32 %v181_v13, %v149_v14 }
  0xf1   :  { %v148_v16 = vld [vmem:[#allocation2] sm:$0xff] }
  0xf2   :  { %v157_v17 = vadd.f32 %v181_v13, %v148_v16  ;;  %160 = vst.msk [vmem:[#allocation8 + $0x8] sm:$0xff] %vm47_vm0, %v158_v15 }
  0xf4   :  { %159 = vst.msk [vmem:[#allocation8] sm:$0xff] %vm47_vm0, %v157_v17 }
  0xf5   :  { %256 = shalt.err (!%p253_p0)
}
  0xf6   :  { %172 = dma.vmem_to_hbm [thread:$0]  %s167_s25, 256, %s329_s3, [#allocation5], %s272_s15, %s272_s15, %s273_s16  }
  0xf7   :  { %269 = dma.done.wait [#allocation5], 256  }
  0xf8   :  { %270 = vsyncadd [#allocation5], 4294967040 }
  0xf9   :  { %176 = vsyncpa [#allocation4], 1 }
  0xfa   :  { %177 = vsyncpa [#allocation7], 1 }
  0xfb   :  { %178 = vsyncpa [#allocation5], 1 }

</bundles_post_ra>
